<compile_context>
chip_gen: v6e
topology: v6e:2x2x1
jax: 0.10.0
libtpu: 0.0.40
codegen_flags: <defaults>
</compile_context>

<pallas_src>
import jax
import jax.numpy as jnp
from jax.experimental import pallas as pl
from jax.experimental.pallas import tpu as pltpu

hidden_size = 128
lookback = 10
output_size = 1
second_size = 64


def _mlp_kernel(x_ref, w1_ref, b1_ref, w2_ref, b2_ref, w3_ref, b3_ref, o_ref):
    # fc1 (MXU, bf16 operands, f32 accumulation) + bias + ReLU (f32, VPU).
    h1 = jnp.dot(x_ref[...], w1_ref[...], preferred_element_type=jnp.float32)
    h1 = jnp.maximum(h1 + b1_ref[...], 0.0)
    # fc2 (MXU, bf16 operands, f32 accumulation) + bias + ReLU.
    h2 = jnp.dot(h1.astype(jnp.bfloat16), w2_ref[...],
                 preferred_element_type=jnp.float32)
    h2 = jnp.maximum(h2 + b2_ref[...], 0.0)
    # fc3: (bm,64)x(64,1) is a degenerate MXU shape (1 useful column plus a
    # full push/drain). Keep it on the VPU + XLU: w3 is a (1,64) f32 row,
    # broadcast-multiply and reduce across lanes.
    out = jnp.sum(h2 * w3_ref[...], axis=-1, keepdims=True) + b3_ref[...]
    o_ref[...] = out.astype(o_ref.dtype)


def _round_up(n, m):
    return ((n + m - 1) // m) * m


def _num_tensorcores():
    """TensorCores per chip (1 on v5e/v6e, 2 on v7x). Used only to round the
    grid-step count to a multiple of the core count so the 'parallel' axis
    loads both cores evenly on megacore parts. Falls back to 1 (single large
    tile), which is the right choice for v5e/v6e."""
    try:
        info = pltpu.get_tpu_info()
        for name in ("num_cores", "core_count", "num_tensorcores",
                     "tensorcores_per_chip"):
            v = getattr(info, name, None)
            if isinstance(v, int) and v >= 1:
                return v
    except Exception:
        pass
    try:
        v = getattr(jax.devices()[0], "num_cores", None)
        if isinstance(v, int) and v >= 1:
            return v
    except Exception:
        pass
    return 1


def _pick_grid(batch, max_bm, num_cores):
    """Pick (bm, steps): as few steps as possible given max_bm, with the step
    count rounded up to a multiple of num_cores so megacore sharding is
    balanced. bm is a multiple of 16 (bf16 sublane packing)."""
    bp = _round_up(batch, 16)
    steps = pl.cdiv(bp, max_bm)
    if num_cores > 1:
        steps = num_cores * pl.cdiv(steps, num_cores)
    bm = _round_up(pl.cdiv(bp, steps), 16)
    return bm, steps


def _jnp_forward(x, params):
    """Plain fused-XLA path for tiny batches (dispatch-overhead bound)."""
    w1, b1, w2, b2, w3, b3 = params
    h1 = jnp.maximum(x @ w1 + b1, 0.0)
    h2 = jnp.maximum(h1 @ w2 + b2, 0.0)
    return h2 @ w3.T + b3


def nlayernet_forward(x, params, *, max_bm=4096, small_batch_cutoff=256):
    """Fused MLP forward. x: [B, lookback] float32. Returns [B, 1] float32."""
    w1, b1, w2, b2, w3, b3 = params
    B, L = x.shape
    assert L == lookback, f"expected last dim {lookback}, got {L}"

    if B <= small_batch_cutoff:
        # Single-step Pallas here is dominated by fixed dispatch / pipeline
        # overhead; plain XLA is as fast or faster.
        return _jnp_forward(x, params)

    num_cores = _num_tensorcores()
    bm, steps = _pick_grid(B, max_bm, num_cores)
    Bp = bm * steps
    if Bp != B:
        x = jnp.pad(x, ((0, Bp - B), (0, 0)))

    # bf16 MXU operands (f32 accumulation in-kernel): ~2x the LHS push rate
    # and half the HBM/VMEM footprint for x. Biases / epilogue stay f32.
    xb = x.astype(jnp.bfloat16)
    w1b = w1.astype(jnp.bfloat16)
    w2b = w2.astype(jnp.bfloat16)

    flops = 2 * Bp * (lookback * hidden_size
                      + hidden_size * second_size
                      + second_size * output_size)
    bytes_accessed = (
        Bp * (lookback * 2 + output_size * 4)                 # x (bf16), out (f32)
        + lookback * hidden_size * 2 + hidden_size * 4        # w1 (bf16), b1
        + hidden_size * second_size * 2 + second_size * 4     # w2 (bf16), b2
        + second_size * 4 + output_size * 4                   # w3, b3
    )

    def batch_tiled(i):
        return (i, 0)

    def replicated(i):
        # Constant block index: weights/biases stay resident in VMEM across
        # grid steps (no per-step re-fetch of these ~40 KB of constants).
        return (0, 0)

    out = pl.pallas_call(
        _mlp_kernel,
        out_shape=jax.ShapeDtypeStruct((Bp, output_size), jnp.float32),
        grid_spec=pltpu.PrefetchScalarGridSpec(
            num_scalar_prefetch=0,
            grid=(steps,),
            in_specs=[
                pl.BlockSpec((bm, L), batch_tiled),                    # x (bf16)
                pl.BlockSpec((lookback, hidden_size), replicated),     # w1 (bf16)
                pl.BlockSpec((1, hidden_size), replicated),            # b1 (f32)
                pl.BlockSpec((hidden_size, second_size), replicated),  # w2 (bf16)
                pl.BlockSpec((1, second_size), replicated),            # b2 (f32)
                pl.BlockSpec((1, second_size), replicated),            # w3 row (f32)
                pl.BlockSpec((1, output_size), replicated),            # b3 (f32)
            ],
            out_specs=pl.BlockSpec((bm, output_size), batch_tiled),
        ),
        compiler_params=pltpu.CompilerParams(
            dimension_semantics=("parallel",),
            # Large bf16+f32 tiles at bm=4096 need more than the 16/32 MiB
            # scoped defaults; 48 MiB still fits v7x's 64 MiB physical VMEM.
            vmem_limit_bytes=48 * 1024 * 1024,
        ),
        cost_estimate=pl.CostEstimate(
            flops=flops, transcendentals=0, bytes_accessed=bytes_accessed),
    )(xb, w1b, b1, w2b, b2, w3, b3)

    return out[:B]


def init_params(key):
    """Deterministic init mimicking PyTorch nn.Linear default (uniform +-1/sqrt(fan_in)).

    w1, w2 stored as [in, out]; w3 as a (1, second_size) row; biases (1, out).
    """
    ks = jax.random.split(key, 6)

    def linear(kw, kb, fan_in, fan_out):
        bound = 1.0 / jnp.sqrt(jnp.float32(fan_in))
        w = jax.random.uniform(kw, (fan_in, fan_out), jnp.float32, -bound, bound)
        b = jax.random.uniform(kb, (1, fan_out), jnp.float32, -bound, bound)
        return w, b

    w1, b1 = linear(ks[0], ks[1], lookback, hidden_size)
    w2, b2 = linear(ks[2], ks[3], hidden_size, second_size)
    w3t, b3 = linear(ks[4], ks[5], second_size, output_size)
    w3 = w3t.T  # (1, second_size) row for the VPU/XLU formulation
    return (w1, b1, w2, b2, w3, b3)


def reference_forward(x, params):
    w1, b1, w2, b2, w3, b3 = params
    h1 = jnp.maximum(x @ w1 + b1, 0.0)
    h2 = jnp.maximum(h1 @ w2 + b2, 0.0)
    return h2 @ w3.T + b3


if __name__ == "__main__":
    key = jax.random.PRNGKey(0)
    kp, kx1, kx2, kx3 = jax.random.split(key, 4)
    params = init_params(kp)

    # (batch, small_batch_cutoff, tolerance):
    #   300, 520 -> Pallas path (above the cutoff), exercises padding + grid.
    #   50 with cutoff=0 -> forces the Pallas path on a tiny padded batch.
    #   50 default -> small-batch XLA fast path (f32, tight tolerance).
    # Pallas-path tolerance is relaxed because fc1/fc2 use bf16 MXU operands
    # (f32 accumulation) while the reference is pure f32.
    checks = (
        (300, 256, 5e-2, kx1),
        (520, 256, 5e-2, kx2),
        (50, 0, 5e-2, kx3),
        (50, 256, 1e-5, kx3),
    )
    for batch, cutoff, tol, kx in checks:
        x = jax.random.normal(kx, (batch, lookback), jnp.float32)
        out = jax.block_until_ready(
            nlayernet_forward(x, params, small_batch_cutoff=cutoff))
        ref = reference_forward(x, params)
        assert out.shape == (batch, output_size)
        assert jnp.allclose(out, ref, atol=tol, rtol=tol), (
            f"mismatch vs reference at batch={batch}, cutoff={cutoff}")

    print("KERNEL_OK")
</pallas_src>

<mosaic_0001>
module attributes {stable_mosaic.version = 11 : i64} {
  func.func @_mlp_kernel(%arg0: i32, %arg1: memref<304x10xbf16, #tpu.memory_space<vmem>>, %arg2: memref<10x128xbf16, #tpu.memory_space<vmem>>, %arg3: memref<1x128xf32, #tpu.memory_space<vmem>>, %arg4: memref<128x64xbf16, #tpu.memory_space<vmem>>, %arg5: memref<1x64xf32, #tpu.memory_space<vmem>>, %arg6: memref<1x64xf32, #tpu.memory_space<vmem>>, %arg7: memref<1x1xf32, #tpu.memory_space<vmem>>, %arg8: memref<304x1xf32, #tpu.memory_space<vmem>>) attributes {dimension_semantics = [#tpu.dimension_semantics<parallel>], iteration_bounds = array<i64: 1>, scalar_prefetch = 0 : i64, scratch_operands = 0 : i64, tpu.core_type = #tpu.core_type<tc>, window_params = [{transform_indices = @transform_0, window_bounds = array<i64: 304, 10>}, {pipeline_mode = #tpu.pipeline_mode<synchronous>, transform_indices = @transform_1, window_bounds = array<i64: 10, 128>}, {pipeline_mode = #tpu.pipeline_mode<synchronous>, transform_indices = @transform_2, window_bounds = array<i64: 1, 128>}, {pipeline_mode = #tpu.pipeline_mode<synchronous>, transform_indices = @transform_3, window_bounds = array<i64: 128, 64>}, {pipeline_mode = #tpu.pipeline_mode<synchronous>, transform_indices = @transform_4, window_bounds = array<i64: 1, 64>}, {pipeline_mode = #tpu.pipeline_mode<synchronous>, transform_indices = @transform_5, window_bounds = array<i64: 1, 64>}, {pipeline_mode = #tpu.pipeline_mode<synchronous>, transform_indices = @transform_6, window_bounds = array<i64: 1, 1>}, {transform_indices = @transform_7, window_bounds = array<i64: 304, 1>}]} {
    %c0 = arith.constant 0 : index
    %c0_0 = arith.constant 0 : index
    %0 = vector.load %arg1[%c0, %c0_0] : memref<304x10xbf16, #tpu.memory_space<vmem>>, vector<304x10xbf16>
    %c0_1 = arith.constant 0 : index
    %c0_2 = arith.constant 0 : index
    %1 = vector.load %arg2[%c0_1, %c0_2] : memref<10x128xbf16, #tpu.memory_space<vmem>>, vector<10x128xbf16>
    %cst = arith.constant dense<0.000000e+00> : vector<304x128xf32>
    %2 = tpu.matmul %0, %1, %cst {dimension_numbers = #tpu.dot_dimension_numbers<[1], [0], [0], [1], [0, 0, 1, 1], [], []>} : vector<304x10xbf16>, vector<10x128xbf16>, vector<304x128xf32> -> vector<304x128xf32>
    %c0_3 = arith.constant 0 : index
    %c0_4 = arith.constant 0 : index
    %3 = vector.load %arg3[%c0_3, %c0_4] : memref<1x128xf32, #tpu.memory_space<vmem>>, vector<1x128xf32>
    %4 = vector.broadcast %3 : vector<1x128xf32> to vector<304x128xf32>
    %5 = arith.addf %2, %4 : vector<304x128xf32>
    %cst_5 = arith.constant 0.000000e+00 : f32
    %6 = vector.broadcast %cst_5 : f32 to vector<304x128xf32>
    %7 = arith.maximumf %5, %6 : vector<304x128xf32>
    %8 = arith.truncf %7 : vector<304x128xf32> to vector<304x128xbf16>
    %c0_6 = arith.constant 0 : index
    %c0_7 = arith.constant 0 : index
    %9 = vector.load %arg4[%c0_6, %c0_7] : memref<128x64xbf16, #tpu.memory_space<vmem>>, vector<128x64xbf16>
    %cst_8 = arith.constant dense<0.000000e+00> : vector<304x64xf32>
    %10 = tpu.matmul %8, %9, %cst_8 {dimension_numbers = #tpu.dot_dimension_numbers<[1], [0], [0], [1], [0, 0, 1, 1], [], []>} : vector<304x128xbf16>, vector<128x64xbf16>, vector<304x64xf32> -> vector<304x64xf32>
    %c0_9 = arith.constant 0 : index
    %c0_10 = arith.constant 0 : index
    %11 = vector.load %arg5[%c0_9, %c0_10] : memref<1x64xf32, #tpu.memory_space<vmem>>, vector<1x64xf32>
    %12 = vector.broadcast %11 : vector<1x64xf32> to vector<304x64xf32>
    %13 = arith.addf %10, %12 : vector<304x64xf32>
    %cst_11 = arith.constant 0.000000e+00 : f32
    %14 = vector.broadcast %cst_11 : f32 to vector<304x64xf32>
    %15 = arith.maximumf %13, %14 : vector<304x64xf32>
    %c0_12 = arith.constant 0 : index
    %c0_13 = arith.constant 0 : index
    %16 = vector.load %arg6[%c0_12, %c0_13] : memref<1x64xf32, #tpu.memory_space<vmem>>, vector<1x64xf32>
    %17 = vector.broadcast %16 : vector<1x64xf32> to vector<304x64xf32>
    %18 = arith.mulf %15, %17 : vector<304x64xf32>
    %cst_14 = arith.constant dense<0.000000e+00> : vector<304xf32>
    %19 = vector.multi_reduction <add>, %18, %cst_14 [1] : vector<304x64xf32> to vector<304xf32>
    %20 = vector.shape_cast %19 : vector<304xf32> to vector<304x1xf32>
    %c0_15 = arith.constant 0 : index
    %c0_16 = arith.constant 0 : index
    %21 = vector.load %arg7[%c0_15, %c0_16] : memref<1x1xf32, #tpu.memory_space<vmem>>, vector<1x1xf32>
    %22 = vector.broadcast %21 : vector<1x1xf32> to vector<304x1xf32>
    %23 = arith.addf %20, %22 : vector<304x1xf32>
    %c0_17 = arith.constant 0 : index
    %c0_18 = arith.constant 0 : index
    %24 = vector.load %arg8[%c0_17, %c0_18] : memref<304x1xf32, #tpu.memory_space<vmem>>, vector<304x1xf32>
    tpu.vector_store %arg8[%c0_17, %c0_18], %23 {strides = array<i32>} : memref<304x1xf32, #tpu.memory_space<vmem>>, vector<304x1xf32>,
    return
  }
  func.func @transform_0(%arg0: i32) -> (i32, i32) {
    %c0_i32 = arith.constant 0 : i32
    %c0_i32_0 = arith.constant 0 : i32
    return %arg0, %c0_i32 : i32, i32
  }
  func.func @transform_1(%arg0: i32) -> (i32, i32) {
    %c0_i32 = arith.constant 0 : i32
    %c0_i32_0 = arith.constant 0 : i32
    %c0_i32_1 = arith.constant 0 : i32
    return %c0_i32, %c0_i32_0 : i32, i32
  }
  func.func @transform_2(%arg0: i32) -> (i32, i32) {
    %c0_i32 = arith.constant 0 : i32
    %c0_i32_0 = arith.constant 0 : i32
    %c0_i32_1 = arith.constant 0 : i32
    return %c0_i32, %c0_i32_0 : i32, i32
  }
  func.func @transform_3(%arg0: i32) -> (i32, i32) {
    %c0_i32 = arith.constant 0 : i32
    %c0_i32_0 = arith.constant 0 : i32
    %c0_i32_1 = arith.constant 0 : i32
    return %c0_i32, %c0_i32_0 : i32, i32
  }
  func.func @transform_4(%arg0: i32) -> (i32, i32) {
    %c0_i32 = arith.constant 0 : i32
    %c0_i32_0 = arith.constant 0 : i32
    %c0_i32_1 = arith.constant 0 : i32
    return %c0_i32, %c0_i32_0 : i32, i32
  }
  func.func @transform_5(%arg0: i32) -> (i32, i32) {
    %c0_i32 = arith.constant 0 : i32
    %c0_i32_0 = arith.constant 0 : i32
    %c0_i32_1 = arith.constant 0 : i32
    return %c0_i32, %c0_i32_0 : i32, i32
  }
  func.func @transform_6(%arg0: i32) -> (i32, i32) {
    %c0_i32 = arith.constant 0 : i32
    %c0_i32_0 = arith.constant 0 : i32
    %c0_i32_1 = arith.constant 0 : i32
    return %c0_i32, %c0_i32_0 : i32, i32
  }
  func.func @transform_7(%arg0: i32) -> (i32, i32) {
    %c0_i32 = arith.constant 0 : i32
    %c0_i32_0 = arith.constant 0 : i32
    return %arg0, %c0_i32 : i32, i32
  }
}

</mosaic_0001>

<bundles_post_ra>
// kernel: tpu_custom_call.1
= control target key start
LH: loop header
LB: loop body
LE: loop exit
PB: predicated region body
PF: predicated region fallthrough
CT: control target
= control target key end

     0   :  { %vm234_vm0 = vcmask 1044480   ;;  %v1336_v0 = vmov 0.0   ;;  %vm1337_vm1 = vmmov 0   ;;  %vm176_vm2 = vcmask 80896   ;;  %s1936_s1 = inlined_call_operand.vmem [shape: bf16[10,128], index: 1, kind: input, shape index: {}]   ;;  %s1937_s0 = inlined_call_operand.vmem [shape: bf16[304,10], index: 0, kind: input, shape index: {}]   ;;  %s1938_s3 = inlined_call_operand.vmem [shape: bf16[128,64], index: 3, kind: input, shape index: {}]   ;;  %s1939_s2 = inlined_call_operand.vmem [shape: f32[1,128], index: 2, kind: input, shape index: {}]   ;;  %s1940_s4 = inlined_call_operand.vmem [shape: f32[1,64], index: 4, kind: input, shape index: {}]   ;;  %s1941_s5 = inlined_call_operand.vmem [shape: f32[1,64], index: 5, kind: input, shape index: {}]   ;;  %s1942_s6 = inlined_call_operand.<no memory space> [shape: f32[1,1], index: 6, kind: input, shape index: {}]   ;;  %s1943_s7 = inlined_call_operand.vmem [shape: f32[304,1], index: 7, kind: output, shape index: {}]  }
   0x1   :  { %1120 = vmatprep.subr.bf16.mxu0 %v1336_v0  ;;  %v1308_v1 = vld [vmem:[%s1936_s1] sm:$0x1f]   ;;  %1122 = vmatprep.mubr.msk.bf16.mxu0 %vm1337_vm1, %v1336_v0  ;;  %v1310_v4 = vld [vmem:[%s1937_s0 + $0x8] sm:$0xff]   ;;  %v1325_v5 = vld [vmem:[%s1938_s3 + $0x38] sm:$0xff]   ;;  %vm819_vm3 = vcmask 523264   ;;  %vm979_vm4 = vcmask 7168  }
   0x2   :  { %1290 = vmatprep.subr.bf16.mxu1 %v1336_v0  ;;  %1218 = vmatprep.mubr.msk.bf16.mxu1 %vm1337_vm1, %v1336_v0  ;;  %v236_v2 = vsel %vm234_vm0, %v1308_v1, 0  ;;  %v1309_v3 = vld [vmem:[%s1937_s0] sm:$0xff]   ;;  %v1311_v6 = vld [vmem:[%s1937_s0 + $0x10] sm:$0xff]   ;;  %v1330_v8 = vld [vmem:[%s1938_s3 + $0x28] sm:$0xff]  }
   0x3   :  { %1121 = vmatpush3.bf16.msra.mxu0 %v236_v2  ;;  %1298 = vmatpush3.bf16.msra.mxu1 %v1325_v5  ;;  %v1329_v7 = vld [vmem:[%s1938_s3 + $0x30] sm:$0xff]   ;;  %v1312_v9 = vld [vmem:[%s1937_s0 + $0x18] sm:$0xff]   ;;  %v1331_v10 = vld [vmem:[%s1938_s3 + $0x20] sm:$0xff]  }
   0x4   :  { %1198 = vmatprep.subr.bf16.mxu0 %v1336_v0  ;;  %1291 = vmatprep.subr.bf16.mxu1 %v1336_v0  ;;  %v1332_v11 = vld [vmem:[%s1938_s3 + $0x18] sm:$0xff]   ;;  %v1313_v12 = vld [vmem:[%s1937_s0 + $0x20] sm:$0xff]   ;;  %v1314_v13 = vld [vmem:[%s1937_s0 + $0x28] sm:$0xff]  }
   0x5   :  { %v1315_v14 = vld [vmem:[%s1937_s0 + $0x30] sm:$0xff]   ;;  %v1316_v15 = vld [vmem:[%s1937_s0 + $0x38] sm:$0xff]   ;;  %v1317_v16 = vld [vmem:[%s1937_s0 + $0x40] sm:$0xff]  }
   0x6   :  { %1123 = vmatmul.mubr.msk.bf16.vlgmr.msra.gmra.mxu0 %vm176_vm2, %v1309_v3  ;;  %v1333_v17 = vld [vmem:[%s1938_s3 + $0x10] sm:$0xff]   ;;  %v1334_v18 = vld [vmem:[%s1938_s3 + $0x8] sm:$0xff]   ;;  %v1335_v20 = vld [vmem:[%s1938_s3] sm:$0xff]  }
   0x7   :  { %1126 = vmatprep.mubr.msk.bf16.mxu0 %vm1337_vm1, %v1336_v0  ;;  %1199 = vmatpush3.bf16.msra.mxu0 %v1325_v5  ;;  %v1318_v19 = vld [vmem:[%s1937_s0 + $0x48] sm:$0xff]   ;;  %v1319_v21 = vld [vmem:[%s1937_s0 + $0x50] sm:$0xff]   ;;  %v1320_v22 = vld [vmem:[%s1937_s0 + $0x58] sm:$0xff]  }
   0x8   :  { %1200 = vmatprep.subr.bf16.mxu0 %v1336_v0  ;;  %1299 = vmatpush3.bf16.msra.mxu1 %v1329_v7  ;;  %v1321_v23 = vld [vmem:[%s1937_s0 + $0x60] sm:$0xff]   ;;  %v1322_v24 = vld [vmem:[%s1937_s0 + $0x68] sm:$0xff]   ;;  %v1323_v25 = vld [vmem:[%s1937_s0 + $0x70] sm:$0xff]  }
   0x9   :  { %1292 = vmatprep.subr.bf16.mxu1 %v1336_v0  ;;  %v1324_v26 = vld [vmem:[%s1937_s0 + $0x78] sm:$0xff]   ;;  %v1326_v27 = vld [vmem:[%s1937_s0 + $0x80] sm:$0xff]   ;;  %v1327_v28 = vld [vmem:[%s1937_s0 + $0x88] sm:$0xff]  }
   0xa   :  { %v1328_v29 = vld [vmem:[%s1937_s0 + $0x90] sm:$0xff]   ;;  %v1543_v30 = vld [vmem:[%s1939_s2] ss:$0 sm:$0xff] }
   0xb   :  { %1201 = vmatpush3.bf16.msra.mxu0 %v1329_v7 }
   0xc   :  { %1202 = vmatprep.subr.bf16.mxu0 %v1336_v0  ;;  %1300 = vmatpush3.bf16.msra.mxu1 %v1330_v8 }
   0xd   :  { %1293 = vmatprep.subr.bf16.mxu1 %v1336_v0 }
   0xe   :  { %1127 = vmatmul.mubr.msk.bf16.gmra.mxu0 %vm176_vm2, %v1310_v4 }
   0xf   :  { %1130 = vmatprep.mubr.msk.bf16.mxu0 %vm1337_vm1, %v1336_v0  ;;  %1203 = vmatpush3.bf16.msra.mxu0 %v1330_v8 }
  0x10   :  { %1204 = vmatprep.subr.bf16.mxu0 %v1336_v0  ;;  %1301 = vmatpush3.bf16.msra.mxu1 %v1331_v10 }
  0x11   :  { %1294 = vmatprep.subr.bf16.mxu1 %v1336_v0 }
  0x13   :  { %1205 = vmatpush3.bf16.msra.mxu0 %v1331_v10 }
  0x14   :  { %1206 = vmatprep.subr.bf16.mxu0 %v1336_v0  ;;  %1302 = vmatpush3.bf16.msra.mxu1 %v1332_v11 }
  0x15   :  { %1295 = vmatprep.subr.bf16.mxu1 %v1336_v0 }
  0x16   :  { %1131 = vmatmul.mubr.msk.bf16.gmra.mxu0 %vm176_vm2, %v1311_v6 }
  0x17   :  { %1134 = vmatprep.mubr.msk.bf16.mxu0 %vm1337_vm1, %v1336_v0  ;;  %1207 = vmatpush3.bf16.msra.mxu0 %v1332_v11 }
  0x18   :  { %1208 = vmatprep.subr.bf16.mxu0 %v1336_v0  ;;  %1303 = vmatpush3.bf16.msra.mxu1 %v1333_v17 }
  0x19   :  { %1296 = vmatprep.subr.bf16.mxu1 %v1336_v0 }
  0x1b   :  { %1209 = vmatpush3.bf16.msra.mxu0 %v1333_v17 }
  0x1c   :  { %1210 = vmatprep.subr.bf16.mxu0 %v1336_v0  ;;  %1304 = vmatpush3.bf16.msra.mxu1 %v1334_v18 }
  0x1d   :  { %1297 = vmatprep.subr.bf16.mxu1 %v1336_v0 }
  0x1e   :  { %1135 = vmatmul.mubr.msk.bf16.gmra.mxu0 %vm176_vm2, %v1312_v9 }
  0x1f   :  { %1138 = vmatprep.mubr.msk.bf16.mxu0 %vm1337_vm1, %v1336_v0  ;;  %1211 = vmatpush3.bf16.msra.mxu0 %v1334_v18 }
  0x20   :  { %1212 = vmatprep.subr.bf16.mxu0 %v1336_v0  ;;  %1305 = vmatpush3.bf16.msra.mxu1 %v1335_v20 }
  0x23   :  { %1213 = vmatpush3.bf16.msra.mxu0 %v1335_v20 }
  0x26   :  { %1139 = vmatmul.mubr.msk.bf16.gmra.mxu0 %vm176_vm2, %v1313_v12 }
  0x27   :  { %1142 = vmatprep.mubr.msk.bf16.mxu0 %vm1337_vm1, %v1336_v0 }
  0x2e   :  { %1143 = vmatmul.mubr.msk.bf16.gmra.mxu0 %vm176_vm2, %v1314_v13 }
  0x2f   :  { %1146 = vmatprep.mubr.msk.bf16.mxu0 %vm1337_vm1, %v1336_v0 }
  0x36   :  { %1147 = vmatmul.mubr.msk.bf16.gmra.mxu0 %vm176_vm2, %v1315_v14 }
  0x37   :  { %1150 = vmatprep.mubr.msk.bf16.mxu0 %vm1337_vm1, %v1336_v0 }
  0x3e   :  { %1151 = vmatmul.mubr.msk.bf16.gmra.mxu0 %vm176_vm2, %v1316_v15 }
  0x3f   :  { %1154 = vmatprep.mubr.msk.bf16.mxu0 %vm1337_vm1, %v1336_v0 }
  0x46   :  { %1155 = vmatmul.mubr.msk.bf16.gmra.mxu0 %vm176_vm2, %v1317_v16 }
  0x47   :  { %1158 = vmatprep.mubr.msk.bf16.mxu0 %vm1337_vm1, %v1336_v0 }
  0x4e   :  { %1159 = vmatmul.mubr.msk.bf16.gmra.mxu0 %vm176_vm2, %v1318_v19 }
  0x4f   :  { %1162 = vmatprep.mubr.msk.bf16.mxu0 %vm1337_vm1, %v1336_v0 }
  0x56   :  { %1163 = vmatmul.mubr.msk.bf16.gmra.mxu0 %vm176_vm2, %v1319_v21 }
  0x57   :  { %1166 = vmatprep.mubr.msk.bf16.mxu0 %vm1337_vm1, %v1336_v0 }
  0x5e   :  { %1167 = vmatmul.mubr.msk.bf16.gmra.mxu0 %vm176_vm2, %v1320_v22 }
  0x5f   :  { %1170 = vmatprep.mubr.msk.bf16.mxu0 %vm1337_vm1, %v1336_v0 }
  0x66   :  { %1171 = vmatmul.mubr.msk.bf16.gmra.mxu0 %vm176_vm2, %v1321_v23 }
  0x67   :  { %1174 = vmatprep.mubr.msk.bf16.mxu0 %vm1337_vm1, %v1336_v0 }
  0x6e   :  { %1175 = vmatmul.mubr.msk.bf16.gmra.mxu0 %vm176_vm2, %v1322_v24 }
  0x6f   :  { %1178 = vmatprep.mubr.msk.bf16.mxu0 %vm1337_vm1, %v1336_v0 }
  0x76   :  { %1179 = vmatmul.mubr.msk.bf16.gmra.mxu0 %vm176_vm2, %v1323_v25 }
  0x77   :  { %1182 = vmatprep.mubr.msk.bf16.mxu0 %vm1337_vm1, %v1336_v0 }
  0x7e   :  { %1183 = vmatmul.mubr.msk.bf16.gmra.mxu0 %vm176_vm2, %v1324_v26 }
  0x7f   :  { %1186 = vmatprep.mubr.msk.bf16.mxu0 %vm1337_vm1, %v1336_v0 }
  0x86   :  { %1187 = vmatmul.mubr.msk.bf16.gmra.mxu0 %vm176_vm2, %v1326_v27 }
  0x87   :  { %1190 = vmatprep.mubr.msk.bf16.mxu0 %vm1337_vm1, %v1336_v0 }
  0x8e   :  { %1191 = vmatmul.mubr.msk.bf16.gmra.mxu0 %vm176_vm2, %v1327_v28 }
  0x8f   :  { %1194 = vmatprep.mubr.msk.bf16.mxu0 %vm1337_vm1, %v1336_v0 }
  0x96   :  { %1195 = vmatmul.mubr.msk.bf16.gmra.mxu0 %vm176_vm2, %v1328_v29 }
  0x97   :  { %1214 = vmatprep.mubr.msk.bf16.mxu0 %vm1337_vm1, %v1336_v0 }
  0xc6   :  { %v272_v31 = vpop.f32.mrf.mxu0 }
  0xc7   :  { %v273_v33 = vadd.f32 %v1543_v30, %v272_v31 }
  0xc8   :  { %v1124_v32 = vpop.f32.mrf.mxu0 }
  0xc9   :  { %v423_v37 = vmax.f32 %v273_v33, 0.0 }
  0xca   :  { %v275_v34 = vpop.f32.mrf.mxu0 }
  0xcb   :  { %v276_v35 = vadd.f32 %v1543_v30, %v275_v34 }
  0xcc   :  { %v1125_v36 = vpop.f32.mrf.mxu0 }
  0xcd   :  { %v424_v38 = vmax.f32 %v276_v35, 0.0 }
  0xce   :  { %v280_v39 = vpop.f32.mrf.mxu0 }
  0xcf   :  { %v461_v40 = vpack.c.bf16 %v424_v38, %v423_v37  ;;  %v281_v42 = vadd.f32 %v1543_v30, %v280_v39 }
  0xd0   :  { %v1128_v41 = vpop.f32.mrf.mxu0 }
  0xd1   :  { %1215 = vmatmul.mubr.bf16.vlgmr.msra.gmra.mxu0 %v461_v40  ;;  %v425_v46 = vmax.f32 %v281_v42, 0.0 }
  0xd2   :  { %v283_v43 = vpop.f32.mrf.mxu0 }
  0xd3   :  { %v284_v44 = vadd.f32 %v1543_v30, %v283_v43 }
  0xd4   :  { %v1129_v45 = vpop.f32.mrf.mxu0 }
  0xd5   :  { %v426_v47 = vmax.f32 %v284_v44, 0.0 }
  0xd6   :  { %v288_v48 = vpop.f32.mrf.mxu0 }
  0xd7   :  { %v462_v49 = vpack.c.bf16 %v426_v47, %v425_v46  ;;  %v289_v51 = vadd.f32 %v1543_v30, %v288_v48 }
  0xd8   :  { %v1132_v50 = vpop.f32.mrf.mxu0 }
  0xd9   :  { %1219 = vmatmul.mubr.bf16.vlgmr.msra.gmra.mxu1 %v462_v49  ;;  %v427_v55 = vmax.f32 %v289_v51, 0.0 }
  0xda   :  { %v291_v52 = vpop.f32.mrf.mxu0  ;;  %1222 = vmatprep.mubr.msk.bf16.mxu1 %vm1337_vm1, %v1336_v0 }
  0xdb   :  { %v292_v53 = vadd.f32 %v1543_v30, %v291_v52 }
  0xdc   :  { %v1133_v54 = vpop.f32.mrf.mxu0 }
  0xdd   :  { %v428_v56 = vmax.f32 %v292_v53, 0.0 }
  0xde   :  { %v296_v57 = vpop.f32.mrf.mxu0 }
  0xdf   :  { %v463_v58 = vpack.c.bf16 %v428_v56, %v427_v55  ;;  %v297_v60 = vadd.f32 %v1543_v30, %v296_v57 }
  0xe0   :  { %v1136_v59 = vpop.f32.mrf.mxu0 }
  0xe1   :  { %1223 = vmatmul.mubr.bf16.gmra.mxu1 %v463_v58  ;;  %v429_v1 = vmax.f32 %v297_v60, 0.0 }
  0xe2   :  { %v299_v61 = vpop.f32.mrf.mxu0  ;;  %1226 = vmatprep.mubr.msk.bf16.mxu1 %vm1337_vm1, %v1336_v0 }
  0xe3   :  { %v300_v62 = vadd.f32 %v1543_v30, %v299_v61 }
  0xe4   :  { %v1137_v63 = vpop.f32.mrf.mxu0 }
  0xe5   :  { %v430_v2 = vmax.f32 %v300_v62, 0.0 }
  0xe6   :  { %v304_v3 = vpop.f32.mrf.mxu0 }
  0xe7   :  { %v464_v4 = vpack.c.bf16 %v430_v2, %v429_v1  ;;  %v305_v6 = vadd.f32 %v1543_v30, %v304_v3 }
  0xe8   :  { %v1140_v5 = vpop.f32.mrf.mxu0 }
  0xe9   :  { %1227 = vmatmul.mubr.bf16.gmra.mxu1 %v464_v4  ;;  %v431_v10 = vmax.f32 %v305_v6, 0.0 }
  0xea   :  { %v307_v7 = vpop.f32.mrf.mxu0  ;;  %1230 = vmatprep.mubr.msk.bf16.mxu1 %vm1337_vm1, %v1336_v0 }
  0xeb   :  { %v308_v8 = vadd.f32 %v1543_v30, %v307_v7 }
  0xec   :  { %v1141_v9 = vpop.f32.mrf.mxu0 }
  0xed   :  { %v432_v11 = vmax.f32 %v308_v8, 0.0 }
  0xee   :  { %v312_v12 = vpop.f32.mrf.mxu0 }
  0xef   :  { %v465_v13 = vpack.c.bf16 %v432_v11, %v431_v10  ;;  %v313_v15 = vadd.f32 %v1543_v30, %v312_v12 }
  0xf0   :  { %v1144_v14 = vpop.f32.mrf.mxu0 }
  0xf1   :  { %1231 = vmatmul.mubr.bf16.gmra.mxu1 %v465_v13  ;;  %v433_v19 = vmax.f32 %v313_v15, 0.0 }
  0xf2   :  { %v315_v16 = vpop.f32.mrf.mxu0  ;;  %1234 = vmatprep.mubr.msk.bf16.mxu1 %vm1337_vm1, %v1336_v0 }
  0xf3   :  { %v316_v17 = vadd.f32 %v1543_v30, %v315_v16 }
  0xf4   :  { %v1145_v18 = vpop.f32.mrf.mxu0 }
  0xf5   :  { %v434_v20 = vmax.f32 %v316_v17, 0.0 }
  0xf6   :  { %v320_v21 = vpop.f32.mrf.mxu0 }
  0xf7   :  { %v466_v22 = vpack.c.bf16 %v434_v20, %v433_v19  ;;  %v321_v24 = vadd.f32 %v1543_v30, %v320_v21 }
  0xf8   :  { %v1148_v23 = vpop.f32.mrf.mxu0 }
  0xf9   :  { %1235 = vmatmul.mubr.bf16.gmra.mxu1 %v466_v22  ;;  %v435_v28 = vmax.f32 %v321_v24, 0.0 }
  0xfa   :  { %v323_v25 = vpop.f32.mrf.mxu0  ;;  %1238 = vmatprep.mubr.msk.bf16.mxu1 %vm1337_vm1, %v1336_v0 }
  0xfb   :  { %v324_v26 = vadd.f32 %v1543_v30, %v323_v25 }
  0xfc   :  { %v1149_v27 = vpop.f32.mrf.mxu0 }
  0xfd   :  { %v436_v29 = vmax.f32 %v324_v26, 0.0 }
  0xfe   :  { %v328_v31 = vpop.f32.mrf.mxu0 }
  0xff   :  { %v467_v32 = vpack.c.bf16 %v436_v29, %v435_v28  ;;  %v329_v34 = vadd.f32 %v1543_v30, %v328_v31 }
 0x100   :  { %v1152_v33 = vpop.f32.mrf.mxu0 }
 0x101   :  { %1239 = vmatmul.mubr.bf16.gmra.mxu1 %v467_v32  ;;  %v437_v38 = vmax.f32 %v329_v34, 0.0 }
 0x102   :  { %v331_v35 = vpop.f32.mrf.mxu0  ;;  %1242 = vmatprep.mubr.msk.bf16.mxu1 %vm1337_vm1, %v1336_v0 }
 0x103   :  { %v332_v36 = vadd.f32 %v1543_v30, %v331_v35 }
 0x104   :  { %v1153_v37 = vpop.f32.mrf.mxu0 }
 0x105   :  { %v438_v39 = vmax.f32 %v332_v36, 0.0 }
 0x106   :  { %v336_v40 = vpop.f32.mrf.mxu0 }
 0x107   :  { %v468_v41 = vpack.c.bf16 %v438_v39, %v437_v38  ;;  %v337_v43 = vadd.f32 %v1543_v30, %v336_v40 }
 0x108   :  { %v1156_v42 = vpop.f32.mrf.mxu0 }
 0x109   :  { %1243 = vmatmul.mubr.bf16.gmra.mxu1 %v468_v41  ;;  %v439_v47 = vmax.f32 %v337_v43, 0.0 }
 0x10a   :  { %v339_v44 = vpop.f32.mrf.mxu0  ;;  %1246 = vmatprep.mubr.msk.bf16.mxu1 %vm1337_vm1, %v1336_v0 }
 0x10b   :  { %v340_v45 = vadd.f32 %v1543_v30, %v339_v44 }
 0x10c   :  { %v1157_v46 = vpop.f32.mrf.mxu0 }
 0x10d   :  { %v440_v48 = vmax.f32 %v340_v45, 0.0 }
 0x10e   :  { %v344_v49 = vpop.f32.mrf.mxu0 }
 0x10f   :  { %v469_v50 = vpack.c.bf16 %v440_v48, %v439_v47  ;;  %v345_v52 = vadd.f32 %v1543_v30, %v344_v49 }
 0x110   :  { %v1160_v51 = vpop.f32.mrf.mxu0 }
 0x111   :  { %1247 = vmatmul.mubr.bf16.gmra.mxu1 %v469_v50  ;;  %v441_v56 = vmax.f32 %v345_v52, 0.0 }
 0x112   :  { %v347_v53 = vpop.f32.mrf.mxu0  ;;  %1250 = vmatprep.mubr.msk.bf16.mxu1 %vm1337_vm1, %v1336_v0 }
 0x113   :  { %v348_v54 = vadd.f32 %v1543_v30, %v347_v53 }
 0x114   :  { %v1161_v55 = vpop.f32.mrf.mxu0 }
 0x115   :  { %v442_v57 = vmax.f32 %v348_v54, 0.0 }
 0x116   :  { %v352_v58 = vpop.f32.mrf.mxu0 }
 0x117   :  { %v470_v59 = vpack.c.bf16 %v442_v57, %v441_v56  ;;  %v353_v61 = vadd.f32 %v1543_v30, %v352_v58 }
 0x118   :  { %v1164_v60 = vpop.f32.mrf.mxu0 }
 0x119   :  { %1251 = vmatmul.mubr.bf16.gmra.mxu1 %v470_v59  ;;  %v443_v2 = vmax.f32 %v353_v61, 0.0 }
 0x11a   :  { %v355_v62 = vpop.f32.mrf.mxu0  ;;  %1254 = vmatprep.mubr.msk.bf16.mxu1 %vm1337_vm1, %v1336_v0 }
 0x11b   :  { %v356_v63 = vadd.f32 %v1543_v30, %v355_v62 }
 0x11c   :  { %v1165_v1 = vpop.f32.mrf.mxu0 }
 0x11d   :  { %v444_v3 = vmax.f32 %v356_v63, 0.0 }
 0x11e   :  { %v360_v4 = vpop.f32.mrf.mxu0 }
 0x11f   :  { %v471_v5 = vpack.c.bf16 %v444_v3, %v443_v2  ;;  %v361_v7 = vadd.f32 %v1543_v30, %v360_v4 }
 0x120   :  { %v1168_v6 = vpop.f32.mrf.mxu0 }
 0x121   :  { %1255 = vmatmul.mubr.bf16.gmra.mxu1 %v471_v5  ;;  %v445_v11 = vmax.f32 %v361_v7, 0.0 }
 0x122   :  { %v363_v8 = vpop.f32.mrf.mxu0  ;;  %1258 = vmatprep.mubr.msk.bf16.mxu1 %vm1337_vm1, %v1336_v0 }
 0x123   :  { %v364_v9 = vadd.f32 %v1543_v30, %v363_v8 }
 0x124   :  { %v1169_v10 = vpop.f32.mrf.mxu0 }
 0x125   :  { %v446_v12 = vmax.f32 %v364_v9, 0.0 }
 0x126   :  { %v368_v13 = vpop.f32.mrf.mxu0 }
 0x127   :  { %v472_v14 = vpack.c.bf16 %v446_v12, %v445_v11  ;;  %v369_v16 = vadd.f32 %v1543_v30, %v368_v13 }
 0x128   :  { %v1172_v15 = vpop.f32.mrf.mxu0 }
 0x129   :  { %1259 = vmatmul.mubr.bf16.gmra.mxu1 %v472_v14  ;;  %v447_v20 = vmax.f32 %v369_v16, 0.0  ;;  %v1620_v15 = vld [vmem:[%s1940_s4] ss:$0 sm:$0xff] }
 0x12a   :  { %v371_v17 = vpop.f32.mrf.mxu0  ;;  %1262 = vmatprep.mubr.msk.bf16.mxu1 %vm1337_vm1, %v1336_v0 }
 0x12b   :  { %v372_v18 = vadd.f32 %v1543_v30, %v371_v17 }
 0x12c   :  { %v1173_v19 = vpop.f32.mrf.mxu0 }
 0x12d   :  { %v448_v21 = vmax.f32 %v372_v18, 0.0 }
 0x12e   :  { %v376_v22 = vpop.f32.mrf.mxu0 }
 0x12f   :  { %v473_v23 = vpack.c.bf16 %v448_v21, %v447_v20  ;;  %v377_v25 = vadd.f32 %v1543_v30, %v376_v22 }
 0x130   :  { %v1176_v24 = vpop.f32.mrf.mxu0 }
 0x131   :  { %1263 = vmatmul.mubr.bf16.gmra.mxu1 %v473_v23  ;;  %v449_v29 = vmax.f32 %v377_v25, 0.0 }
 0x132   :  { %v379_v26 = vpop.f32.mrf.mxu0  ;;  %1266 = vmatprep.mubr.msk.bf16.mxu1 %vm1337_vm1, %v1336_v0 }
 0x133   :  { %v380_v27 = vadd.f32 %v1543_v30, %v379_v26 }
 0x134   :  { %v1177_v28 = vpop.f32.mrf.mxu0 }
 0x135   :  { %v450_v31 = vmax.f32 %v380_v27, 0.0  ;;  %v12_v28 = vstv %s1942_s6 }
 0x136   :  { %v384_v32 = vpop.f32.mrf.mxu0  ;;  %13 = vst [vmem:[#allocation2] sm:$0x1] %v12_v28 }
 0x137   :  { %v474_v33 = vpack.c.bf16 %v450_v31, %v449_v29  ;;  %v385_v35 = vadd.f32 %v1543_v30, %v384_v32 }
 0x138   :  { %v1180_v34 = vpop.f32.mrf.mxu0 }
 0x139   :  { %1267 = vmatmul.mubr.bf16.gmra.mxu1 %v474_v33  ;;  %v451_v39 = vmax.f32 %v385_v35, 0.0 }
 0x13a   :  { %v387_v36 = vpop.f32.mrf.mxu0  ;;  %1270 = vmatprep.mubr.msk.bf16.mxu1 %vm1337_vm1, %v1336_v0 }
 0x13b   :  { %v388_v37 = vadd.f32 %v1543_v30, %v387_v36 }
 0x13c   :  { %v1181_v38 = vpop.f32.mrf.mxu0 }
 0x13d   :  { %v452_v40 = vmax.f32 %v388_v37, 0.0 }
 0x13e   :  { %v392_v41 = vpop.f32.mrf.mxu0 }
 0x13f   :  { %v475_v42 = vpack.c.bf16 %v452_v40, %v451_v39  ;;  %v393_v44 = vadd.f32 %v1543_v30, %v392_v41 }
 0x140   :  { %v1184_v43 = vpop.f32.mrf.mxu0 }
 0x141   :  { %1271 = vmatmul.mubr.bf16.gmra.mxu1 %v475_v42  ;;  %v453_v48 = vmax.f32 %v393_v44, 0.0 }
 0x142   :  { %v395_v45 = vpop.f32.mrf.mxu0  ;;  %1274 = vmatprep.mubr.msk.bf16.mxu1 %vm1337_vm1, %v1336_v0 }
 0x143   :  { %v396_v46 = vadd.f32 %v1543_v30, %v395_v45 }
 0x144   :  { %v1185_v47 = vpop.f32.mrf.mxu0 }
 0x145   :  { %v454_v49 = vmax.f32 %v396_v46, 0.0 }
 0x146   :  { %v400_v50 = vpop.f32.mrf.mxu0 }
 0x147   :  { %v476_v51 = vpack.c.bf16 %v454_v49, %v453_v48  ;;  %v401_v53 = vadd.f32 %v1543_v30, %v400_v50 }
 0x148   :  { %v1188_v52 = vpop.f32.mrf.mxu0 }
 0x149   :  { %1275 = vmatmul.mubr.bf16.gmra.mxu1 %v476_v51  ;;  %v455_v57 = vmax.f32 %v401_v53, 0.0 }
 0x14a   :  { %v403_v54 = vpop.f32.mrf.mxu0  ;;  %1278 = vmatprep.mubr.msk.bf16.mxu1 %vm1337_vm1, %v1336_v0 }
 0x14b   :  { %v404_v55 = vadd.f32 %v1543_v30, %v403_v54 }
 0x14c   :  { %v1189_v56 = vpop.f32.mrf.mxu0 }
 0x14d   :  { %v456_v58 = vmax.f32 %v404_v55, 0.0 }
 0x14e   :  { %v408_v59 = vpop.f32.mrf.mxu0 }
 0x14f   :  { %v477_v60 = vpack.c.bf16 %v456_v58, %v455_v57  ;;  %v409_v62 = vadd.f32 %v1543_v30, %v408_v59 }
 0x150   :  { %v1192_v61 = vpop.f32.mrf.mxu0 }
 0x151   :  { %1279 = vmatmul.mubr.bf16.gmra.mxu1 %v477_v60  ;;  %v457_v3 = vmax.f32 %v409_v62, 0.0 }
 0x152   :  { %v411_v63 = vpop.f32.mrf.mxu0  ;;  %1282 = vmatprep.mubr.msk.bf16.mxu1 %vm1337_vm1, %v1336_v0 }
 0x153   :  { %v412_v1 = vadd.f32 %v1543_v30, %v411_v63 }
 0x154   :  { %v1193_v2 = vpop.f32.mrf.mxu0 }
 0x155   :  { %v458_v4 = vmax.f32 %v412_v1, 0.0 }
 0x156   :  { %v416_v5 = vpop.f32.mrf.mxu0 }
 0x157   :  { %v478_v6 = vpack.c.bf16 %v458_v4, %v457_v3  ;;  %v417_v8 = vadd.f32 %v1543_v30, %v416_v5 }
 0x158   :  { %v1196_v7 = vpop.f32.mrf.mxu0 }
 0x159   :  { %1283 = vmatmul.mubr.bf16.gmra.mxu1 %v478_v6  ;;  %v459_v12 = vmax.f32 %v417_v8, 0.0 }
 0x15a   :  { %v419_v9 = vpop.f32.mrf.mxu0  ;;  %1286 = vmatprep.mubr.msk.bf16.mxu1 %vm1337_vm1, %v1336_v0  ;;  %v1626_v0 = vld [vmem:[%s1941_s5] ss:$0 sm:$0xff] }
 0x15b   :  { %v420_v10 = vadd.f32 %v1543_v30, %v419_v9 }
 0x15c   :  { %v1197_v11 = vpop.f32.mrf.mxu0 }
 0x15d   :  { %v460_v13 = vmax.f32 %v420_v10, 0.0 }
 0x15f   :  { %v479_v14 = vpack.c.bf16 %v460_v13, %v459_v12 }
 0x161   :  { %1287 = vmatmul.mubr.bf16.gmra.mxu1 %v479_v14 }
 0x191   :  { %v585_v16 = vpop.f32.mrf.mxu0 }
 0x192   :  { %v586_v17 = vadd.f32 %v1620_v15, %v585_v16 }
 0x193   :  { %v1216_v18 = vpop.f32.mrf.mxu0 }
 0x194   :  { %v736_v30 = vmax.f32 %v586_v17, 0.0 }
 0x195   :  { %v588_v19 = vpop.f32.mrf.mxu0 }
 0x196   :  { %v589_v20 = vadd.f32 %v1620_v15, %v588_v19  ;;  %v781_v21 = vmul.f32 %v1626_v0, %v736_v30 }
 0x197   :  { %v1217_v22 = vpop.f32.mrf.mxu0 }
 0x198   :  { %v737_v23 = vmax.f32 %v589_v20, 0.0  ;;  %v820_v24 = vsel %vm819_vm3, %v781_v21, 0.0 }
 0x199   :  { %v593_v25 = vpop.f32.mrf.mxu1  ;;  %821 = vadd.xlane.f32.xlu0 %v820_v24 }
 0x19a   :  { %v594_v26 = vadd.f32 %v1620_v15, %v593_v25  ;;  %v782_v27 = vmul.f32 %v1626_v0, %v737_v23 }
 0x19b   :  { %v1220_v29 = vpop.f32.mrf.mxu1 }
 0x19c   :  { %v738_v31 = vmax.f32 %v594_v26, 0.0  ;;  %v823_v32 = vsel %vm819_vm3, %v782_v27, 0.0 }
 0x19d   :  { %v596_v33 = vpop.f32.mrf.mxu1  ;;  %824 = vadd.xlane.f32.xlu0 %v823_v32 }
 0x19e   :  { %v597_v34 = vadd.f32 %v1620_v15, %v596_v33  ;;  %v783_v35 = vmul.f32 %v1626_v0, %v738_v31 }
 0x19f   :  { %v1221_v36 = vpop.f32.mrf.mxu1 }
 0x1a0   :  { %v739_v37 = vmax.f32 %v597_v34, 0.0  ;;  %v826_v38 = vsel %vm819_vm3, %v783_v35, 0.0 }
 0x1a1   :  { %827 = vadd.xlane.f32.xlu1 %v826_v38  ;;  %v601_v39 = vpop.f32.mrf.mxu1 }
 0x1a2   :  { %v602_v40 = vadd.f32 %v1620_v15, %v601_v39  ;;  %v784_v41 = vmul.f32 %v1626_v0, %v739_v37 }
 0x1a3   :  { %v1224_v42 = vpop.f32.mrf.mxu1 }
 0x1a4   :  { %v740_v43 = vmax.f32 %v602_v40, 0.0  ;;  %v829_v44 = vsel %vm819_vm3, %v784_v41, 0.0 }
 0x1a5   :  { %830 = vadd.xlane.f32.xlu1 %v829_v44  ;;  %v604_v45 = vpop.f32.mrf.mxu1 }
 0x1a6   :  { %v605_v46 = vadd.f32 %v1620_v15, %v604_v45  ;;  %v785_v47 = vmul.f32 %v1626_v0, %v740_v43 }
 0x1a7   :  { %v1225_v48 = vpop.f32.mrf.mxu1 }
 0x1a8   :  { %v741_v49 = vmax.f32 %v605_v46, 0.0  ;;  %v832_v50 = vsel %vm819_vm3, %v785_v47, 0.0 }
 0x1a9   :  { %v609_v51 = vpop.f32.mrf.mxu1  ;;  %833 = vadd.xlane.f32.xlu0 %v832_v50 }
 0x1aa   :  { %v610_v52 = vadd.f32 %v1620_v15, %v609_v51  ;;  %v786_v53 = vmul.f32 %v1626_v0, %v741_v49 }
 0x1ab   :  { %v1228_v54 = vpop.f32.mrf.mxu1 }
 0x1ac   :  { %v742_v55 = vmax.f32 %v610_v52, 0.0  ;;  %v835_v56 = vsel %vm819_vm3, %v786_v53, 0.0 }
 0x1ad   :  { %836 = vadd.xlane.f32.xlu1 %v835_v56  ;;  %v612_v57 = vpop.f32.mrf.mxu1 }
 0x1ae   :  { %v613_v58 = vadd.f32 %v1620_v15, %v612_v57  ;;  %v787_v59 = vmul.f32 %v1626_v0, %v742_v55 }
 0x1af   :  { %v1229_v60 = vpop.f32.mrf.mxu1 }
 0x1b0   :  { %v743_v61 = vmax.f32 %v613_v58, 0.0  ;;  %v838_v62 = vsel %vm819_vm3, %v787_v59, 0.0 }
 0x1b1   :  { %v617_v63 = vpop.f32.mrf.mxu1  ;;  %839 = vadd.xlane.f32.xlu0 %v838_v62 }
 0x1b2   :  { %v618_v1 = vadd.f32 %v1620_v15, %v617_v63  ;;  %v788_v2 = vmul.f32 %v1626_v0, %v743_v61 }
 0x1b3   :  { %v1232_v3 = vpop.f32.mrf.mxu1 }
 0x1b4   :  { %v744_v4 = vmax.f32 %v618_v1, 0.0  ;;  %v841_v5 = vsel %vm819_vm3, %v788_v2, 0.0 }
 0x1b5   :  { %842 = vadd.xlane.f32.xlu1 %v841_v5  ;;  %v620_v6 = vpop.f32.mrf.mxu1 }
 0x1b6   :  { %v621_v7 = vadd.f32 %v1620_v15, %v620_v6  ;;  %v789_v8 = vmul.f32 %v1626_v0, %v744_v4 }
 0x1b7   :  { %v1233_v9 = vpop.f32.mrf.mxu1 }
 0x1b8   :  { %v745_v10 = vmax.f32 %v621_v7, 0.0  ;;  %v844_v11 = vsel %vm819_vm3, %v789_v8, 0.0 }
 0x1b9   :  { %v625_v12 = vpop.f32.mrf.mxu1  ;;  %845 = vadd.xlane.f32.xlu0 %v844_v11 }
 0x1ba   :  { %v626_v13 = vadd.f32 %v1620_v15, %v625_v12  ;;  %v790_v14 = vmul.f32 %v1626_v0, %v745_v10 }
 0x1bb   :  { %v1236_v16 = vpop.f32.mrf.mxu1 }
 0x1bc   :  { %v746_v17 = vmax.f32 %v626_v13, 0.0  ;;  %v847_v18 = vsel %vm819_vm3, %v790_v14, 0.0 }
 0x1bd   :  { %848 = vadd.xlane.f32.xlu1 %v847_v18  ;;  %v628_v30 = vpop.f32.mrf.mxu1 }
 0x1be   :  { %v629_v19 = vadd.f32 %v1620_v15, %v628_v30  ;;  %v791_v20 = vmul.f32 %v1626_v0, %v746_v17 }
 0x1bf   :  { %v1237_v21 = vpop.f32.mrf.mxu1 }
 0x1c0   :  { %v747_v22 = vmax.f32 %v629_v19, 0.0  ;;  %v850_v23 = vsel %vm819_vm3, %v791_v20, 0.0 }
 0x1c1   :  { %v633_v24 = vpop.f32.mrf.mxu1  ;;  %851 = vadd.xlane.f32.xlu0 %v850_v23 }
 0x1c2   :  { %v634_v25 = vadd.f32 %v1620_v15, %v633_v24  ;;  %v792_v26 = vmul.f32 %v1626_v0, %v747_v22 }
 0x1c3   :  { %v1240_v27 = vpop.f32.mrf.mxu1 }
 0x1c4   :  { %v748_v28 = vmax.f32 %v634_v25, 0.0  ;;  %v853_v29 = vsel %vm819_vm3, %v792_v26, 0.0 }
 0x1c5   :  { %854 = vadd.xlane.f32.xlu1 %v853_v29  ;;  %v636_v31 = vpop.f32.mrf.mxu1 }
 0x1c6   :  { %v637_v32 = vadd.f32 %v1620_v15, %v636_v31  ;;  %v793_v33 = vmul.f32 %v1626_v0, %v748_v28 }
 0x1c7   :  { %v1241_v34 = vpop.f32.mrf.mxu1 }
 0x1c8   :  { %v749_v35 = vmax.f32 %v637_v32, 0.0  ;;  %v856_v36 = vsel %vm819_vm3, %v793_v33, 0.0 }
 0x1c9   :  { %v641_v37 = vpop.f32.mrf.mxu1  ;;  %857 = vadd.xlane.f32.xlu0 %v856_v36 }
 0x1ca   :  { %v642_v38 = vadd.f32 %v1620_v15, %v641_v37  ;;  %v794_v39 = vmul.f32 %v1626_v0, %v749_v35 }
 0x1cb   :  { %v1244_v40 = vpop.f32.mrf.mxu1 }
 0x1cc   :  { %v750_v41 = vmax.f32 %v642_v38, 0.0  ;;  %v859_v42 = vsel %vm819_vm3, %v794_v39, 0.0 }
 0x1cd   :  { %860 = vadd.xlane.f32.xlu1 %v859_v42  ;;  %v644_v43 = vpop.f32.mrf.mxu1 }
 0x1ce   :  { %v645_v44 = vadd.f32 %v1620_v15, %v644_v43  ;;  %v795_v45 = vmul.f32 %v1626_v0, %v750_v41 }
 0x1cf   :  { %v1245_v46 = vpop.f32.mrf.mxu1 }
 0x1d0   :  { %v751_v47 = vmax.f32 %v645_v44, 0.0  ;;  %v862_v48 = vsel %vm819_vm3, %v795_v45, 0.0 }
 0x1d1   :  { %v649_v49 = vpop.f32.mrf.mxu1  ;;  %863 = vadd.xlane.f32.xlu0 %v862_v48 }
 0x1d2   :  { %v650_v50 = vadd.f32 %v1620_v15, %v649_v49  ;;  %v796_v51 = vmul.f32 %v1626_v0, %v751_v47 }
 0x1d3   :  { %v1248_v52 = vpop.f32.mrf.mxu1 }
 0x1d4   :  { %v752_v53 = vmax.f32 %v650_v50, 0.0  ;;  %v865_v54 = vsel %vm819_vm3, %v796_v51, 0.0 }
 0x1d5   :  { %866 = vadd.xlane.f32.xlu1 %v865_v54  ;;  %v652_v55 = vpop.f32.mrf.mxu1 }
 0x1d6   :  { %v653_v56 = vadd.f32 %v1620_v15, %v652_v55  ;;  %v797_v57 = vmul.f32 %v1626_v0, %v752_v53 }
 0x1d7   :  { %v1249_v58 = vpop.f32.mrf.mxu1 }
 0x1d8   :  { %v753_v59 = vmax.f32 %v653_v56, 0.0  ;;  %v868_v60 = vsel %vm819_vm3, %v797_v57, 0.0 }
 0x1d9   :  { %v657_v61 = vpop.f32.mrf.mxu1  ;;  %869 = vadd.xlane.f32.xlu0 %v868_v60 }
 0x1da   :  { %v658_v62 = vadd.f32 %v1620_v15, %v657_v61  ;;  %v798_v63 = vmul.f32 %v1626_v0, %v753_v59 }
 0x1db   :  { %v1252_v1 = vpop.f32.mrf.mxu1 }
 0x1dc   :  { %v754_v2 = vmax.f32 %v658_v62, 0.0  ;;  %v871_v3 = vsel %vm819_vm3, %v798_v63, 0.0 }
 0x1dd   :  { %872 = vadd.xlane.f32.xlu1 %v871_v3  ;;  %v660_v4 = vpop.f32.mrf.mxu1 }
 0x1de   :  { %v661_v5 = vadd.f32 %v1620_v15, %v660_v4  ;;  %v799_v6 = vmul.f32 %v1626_v0, %v754_v2 }
 0x1df   :  { %v1253_v7 = vpop.f32.mrf.mxu1 }
 0x1e0   :  { %v755_v8 = vmax.f32 %v661_v5, 0.0  ;;  %v874_v9 = vsel %vm819_vm3, %v799_v6, 0.0 }
 0x1e1   :  { %v665_v10 = vpop.f32.mrf.mxu1  ;;  %875 = vadd.xlane.f32.xlu0 %v874_v9 }
 0x1e2   :  { %v666_v11 = vadd.f32 %v1620_v15, %v665_v10  ;;  %v800_v12 = vmul.f32 %v1626_v0, %v755_v8 }
 0x1e3   :  { %v1256_v13 = vpop.f32.mrf.mxu1 }
 0x1e4   :  { %v756_v14 = vmax.f32 %v666_v11, 0.0  ;;  %v877_v16 = vsel %vm819_vm3, %v800_v12, 0.0 }
 0x1e5   :  { %878 = vadd.xlane.f32.xlu1 %v877_v16  ;;  %v668_v17 = vpop.f32.mrf.mxu1 }
 0x1e6   :  { %v669_v18 = vadd.f32 %v1620_v15, %v668_v17  ;;  %v801_v30 = vmul.f32 %v1626_v0, %v756_v14 }
 0x1e7   :  { %v1257_v19 = vpop.f32.mrf.mxu1 }
 0x1e8   :  { %v757_v20 = vmax.f32 %v669_v18, 0.0  ;;  %v880_v21 = vsel %vm819_vm3, %v801_v30, 0.0 }
 0x1e9   :  { %v673_v22 = vpop.f32.mrf.mxu1  ;;  %881 = vadd.xlane.f32.xlu0 %v880_v21 }
 0x1ea   :  { %v674_v23 = vadd.f32 %v1620_v15, %v673_v22  ;;  %v802_v24 = vmul.f32 %v1626_v0, %v757_v20 }
 0x1eb   :  { %v1260_v25 = vpop.f32.mrf.mxu1 }
 0x1ec   :  { %v758_v26 = vmax.f32 %v674_v23, 0.0  ;;  %v883_v27 = vsel %vm819_vm3, %v802_v24, 0.0 }
 0x1ed   :  { %884 = vadd.xlane.f32.xlu1 %v883_v27  ;;  %v676_v28 = vpop.f32.mrf.mxu1 }
 0x1ee   :  { %v677_v29 = vadd.f32 %v1620_v15, %v676_v28  ;;  %v803_v31 = vmul.f32 %v1626_v0, %v758_v26 }
 0x1ef   :  { %v1261_v32 = vpop.f32.mrf.mxu1 }
 0x1f0   :  { %v759_v33 = vmax.f32 %v677_v29, 0.0  ;;  %v886_v34 = vsel %vm819_vm3, %v803_v31, 0.0 }
 0x1f1   :  { %v681_v35 = vpop.f32.mrf.mxu1  ;;  %887 = vadd.xlane.f32.xlu0 %v886_v34 }
 0x1f2   :  { %v682_v36 = vadd.f32 %v1620_v15, %v681_v35  ;;  %v804_v37 = vmul.f32 %v1626_v0, %v759_v33 }
 0x1f3   :  { %v1264_v38 = vpop.f32.mrf.mxu1 }
 0x1f4   :  { %v760_v39 = vmax.f32 %v682_v36, 0.0  ;;  %v889_v40 = vsel %vm819_vm3, %v804_v37, 0.0 }
 0x1f5   :  { %890 = vadd.xlane.f32.xlu1 %v889_v40  ;;  %v684_v41 = vpop.f32.mrf.mxu1 }
 0x1f6   :  { %v685_v42 = vadd.f32 %v1620_v15, %v684_v41  ;;  %v805_v43 = vmul.f32 %v1626_v0, %v760_v39 }
 0x1f7   :  { %v1265_v44 = vpop.f32.mrf.mxu1 }
 0x1f8   :  { %v761_v45 = vmax.f32 %v685_v42, 0.0  ;;  %v892_v46 = vsel %vm819_vm3, %v805_v43, 0.0 }
 0x1f9   :  { %v689_v47 = vpop.f32.mrf.mxu1  ;;  %893 = vadd.xlane.f32.xlu0 %v892_v46 }
 0x1fa   :  { %v690_v48 = vadd.f32 %v1620_v15, %v689_v47  ;;  %v806_v49 = vmul.f32 %v1626_v0, %v761_v45  ;;  %v1736_v45 = vld [vmem:[#allocation2] ss:$0 sm:$0xff] }
 0x1fb   :  { %v1268_v50 = vpop.f32.mrf.mxu1 }
 0x1fc   :  { %v762_v51 = vmax.f32 %v690_v48, 0.0  ;;  %v895_v52 = vsel %vm819_vm3, %v806_v49, 0.0 }
 0x1fd   :  { %896 = vadd.xlane.f32.xlu1 %v895_v52  ;;  %v692_v53 = vpop.f32.mrf.mxu1 }
 0x1fe   :  { %v693_v54 = vadd.f32 %v1620_v15, %v692_v53  ;;  %v807_v55 = vmul.f32 %v1626_v0, %v762_v51 }
 0x1ff   :  { %v1269_v56 = vpop.f32.mrf.mxu1 }
 0x200   :  { %v763_v57 = vmax.f32 %v693_v54, 0.0  ;;  %v898_v58 = vsel %vm819_vm3, %v807_v55, 0.0 }
 0x201   :  { %v697_v59 = vpop.f32.mrf.mxu1  ;;  %899 = vadd.xlane.f32.xlu0 %v898_v58 }
 0x202   :  { %v698_v60 = vadd.f32 %v1620_v15, %v697_v59  ;;  %v808_v61 = vmul.f32 %v1626_v0, %v763_v57 }
 0x203   :  { %v1272_v62 = vpop.f32.mrf.mxu1 }
 0x204   :  { %v764_v63 = vmax.f32 %v698_v60, 0.0  ;;  %v901_v1 = vsel %vm819_vm3, %v808_v61, 0.0 }
 0x205   :  { %902 = vadd.xlane.f32.xlu1 %v901_v1  ;;  %v700_v2 = vpop.f32.mrf.mxu1 }
 0x206   :  { %v701_v3 = vadd.f32 %v1620_v15, %v700_v2  ;;  %v809_v4 = vmul.f32 %v1626_v0, %v764_v63 }
 0x207   :  { %v1273_v5 = vpop.f32.mrf.mxu1 }
 0x208   :  { %v765_v6 = vmax.f32 %v701_v3, 0.0  ;;  %v904_v7 = vsel %vm819_vm3, %v809_v4, 0.0 }
 0x209   :  { %v705_v8 = vpop.f32.mrf.mxu1  ;;  %905 = vadd.xlane.f32.xlu0 %v904_v7 }
 0x20a   :  { %v706_v9 = vadd.f32 %v1620_v15, %v705_v8  ;;  %v810_v10 = vmul.f32 %v1626_v0, %v765_v6 }
 0x20b   :  { %v1276_v11 = vpop.f32.mrf.mxu1 }
 0x20c   :  { %v766_v12 = vmax.f32 %v706_v9, 0.0  ;;  %v907_v13 = vsel %vm819_vm3, %v810_v10, 0.0 }
 0x20d   :  { %908 = vadd.xlane.f32.xlu1 %v907_v13  ;;  %v708_v14 = vpop.f32.mrf.mxu1 }
 0x20e   :  { %v709_v16 = vadd.f32 %v1620_v15, %v708_v14  ;;  %v811_v17 = vmul.f32 %v1626_v0, %v766_v12 }
 0x20f   :  { %v1277_v18 = vpop.f32.mrf.mxu1 }
 0x210   :  { %v767_v30 = vmax.f32 %v709_v16, 0.0  ;;  %v910_v19 = vsel %vm819_vm3, %v811_v17, 0.0 }
 0x211   :  { %v713_v20 = vpop.f32.mrf.mxu1  ;;  %911 = vadd.xlane.f32.xlu0 %v910_v19 }
 0x212   :  { %v714_v21 = vadd.f32 %v1620_v15, %v713_v20  ;;  %v812_v22 = vmul.f32 %v1626_v0, %v767_v30 }
 0x213   :  { %v1280_v23 = vpop.f32.mrf.mxu1 }
 0x214   :  { %v768_v24 = vmax.f32 %v714_v21, 0.0  ;;  %v913_v25 = vsel %vm819_vm3, %v812_v22, 0.0 }
 0x215   :  { %914 = vadd.xlane.f32.xlu1 %v913_v25  ;;  %v716_v26 = vpop.f32.mrf.mxu1 }
 0x216   :  { %v717_v27 = vadd.f32 %v1620_v15, %v716_v26  ;;  %v813_v28 = vmul.f32 %v1626_v0, %v768_v24 }
 0x217   :  { %v1281_v29 = vpop.f32.mrf.mxu1 }
 0x218   :  { %v769_v31 = vmax.f32 %v717_v27, 0.0  ;;  %v916_v32 = vsel %vm819_vm3, %v813_v28, 0.0 }
 0x219   :  { %v721_v33 = vpop.f32.mrf.mxu1  ;;  %917 = vadd.xlane.f32.xlu0 %v916_v32 }
 0x21a   :  { %v722_v34 = vadd.f32 %v1620_v15, %v721_v33  ;;  %v814_v35 = vmul.f32 %v1626_v0, %v769_v31 }
 0x21b   :  { %v1284_v36 = vpop.f32.mrf.mxu1 }
 0x21c   :  { %v770_v37 = vmax.f32 %v722_v34, 0.0  ;;  %v919_v38 = vsel %vm819_vm3, %v814_v35, 0.0 }
 0x21d   :  { %920 = vadd.xlane.f32.xlu1 %v919_v38  ;;  %v724_v39 = vpop.f32.mrf.mxu1 }
 0x21e   :  { %v725_v40 = vadd.f32 %v1620_v15, %v724_v39  ;;  %v815_v41 = vmul.f32 %v1626_v0, %v770_v37 }
 0x21f   :  { %v1285_v42 = vpop.f32.mrf.mxu1 }
 0x220   :  { %v771_v43 = vmax.f32 %v725_v40, 0.0  ;;  %v922_v44 = vsel %vm819_vm3, %v815_v41, 0.0 }
 0x221   :  { %v729_v46 = vpop.f32.mrf.mxu1  ;;  %923 = vadd.xlane.f32.xlu0 %v922_v44 }
 0x222   :  { %v730_v47 = vadd.f32 %v1620_v15, %v729_v46  ;;  %v822_v48 = vpop.xlane.xlu0 %821  ;;  %v816_v49 = vmul.f32 %v1626_v0, %v771_v43 }
 0x223   :  { %v941_v50 = vadd.f32 %v1736_v45, %v822_v48  ;;  %v1288_v51 = vpop.f32.mrf.mxu1 }
 0x224   :  { %v772_v52 = vmax.f32 %v730_v47, 0.0  ;;  %v925_v53 = vsel %vm819_vm3, %v816_v49, 0.0 }
 0x225   :  { %980 = vst.msk [vmem:[%s1943_s7] sm:$0xff] %vm979_vm4, %v941_v50  ;;  %926 = vadd.xlane.f32.xlu1 %v925_v53  ;;  %v732_v54 = vpop.f32.mrf.mxu1 }
 0x226   :  { %v733_v55 = vadd.f32 %v1620_v15, %v732_v54  ;;  %v825_v56 = vpop.xlane.xlu0 %824  ;;  %v817_v57 = vmul.f32 %v1626_v0, %v772_v52 }
 0x227   :  { %v942_v58 = vadd.f32 %v1736_v45, %v825_v56  ;;  %v1289_v59 = vpop.f32.mrf.mxu1 }
 0x228   :  { %v773_v60 = vmax.f32 %v733_v55, 0.0  ;;  %v928_v61 = vsel %vm819_vm3, %v817_v57, 0.0 }
 0x229   :  { %981 = vst.msk [vmem:[%s1943_s7 + $0x8] sm:$0xff] %vm979_vm4, %v942_v58  ;;  %929 = vadd.xlane.f32.xlu0 %v928_v61 }
 0x22a   :  { %v828_v62 = vpop.xlane.xlu1 %827  ;;  %v818_v63 = vmul.f32 %v1626_v0, %v773_v60 }
 0x22b   :  { %v943_v15 = vadd.f32 %v1736_v45, %v828_v62 }
 0x22c   :  { %v931_v1 = vsel %vm819_vm3, %v818_v63, 0.0 }
 0x22d   :  { %982 = vst.msk [vmem:[%s1943_s7 + $0x10] sm:$0xff] %vm979_vm4, %v943_v15  ;;  %932 = vadd.xlane.f32.xlu1 %v931_v1 }
 0x22e   :  { %v831_v2 = vpop.xlane.xlu1 %830 }
 0x22f   :  { %v944_v3 = vadd.f32 %v1736_v45, %v831_v2 }
 0x231   :  { %983 = vst.msk [vmem:[%s1943_s7 + $0x18] sm:$0xff] %vm979_vm4, %v944_v3 }
 0x232   :  { %v834_v4 = vpop.xlane.xlu0 %833 }
 0x233   :  { %v945_v0 = vadd.f32 %v1736_v45, %v834_v4 }
 0x235   :  { %984 = vst.msk [vmem:[%s1943_s7 + $0x20] sm:$0xff] %vm979_vm4, %v945_v0 }
 0x236   :  { %v837_v5 = vpop.xlane.xlu1 %836 }
 0x237   :  { %v946_v6 = vadd.f32 %v1736_v45, %v837_v5 }
 0x239   :  { %985 = vst.msk [vmem:[%s1943_s7 + $0x28] sm:$0xff] %vm979_vm4, %v946_v6 }
 0x23a   :  { %v840_v7 = vpop.xlane.xlu0 %839 }
 0x23b   :  { %v947_v8 = vadd.f32 %v1736_v45, %v840_v7 }
 0x23d   :  { %986 = vst.msk [vmem:[%s1943_s7 + $0x30] sm:$0xff] %vm979_vm4, %v947_v8 }
 0x23e   :  { %v843_v9 = vpop.xlane.xlu1 %842 }
 0x23f   :  { %v948_v10 = vadd.f32 %v1736_v45, %v843_v9 }
 0x241   :  { %987 = vst.msk [vmem:[%s1943_s7 + $0x38] sm:$0xff] %vm979_vm4, %v948_v10 }
 0x242   :  { %v846_v11 = vpop.xlane.xlu0 %845 }
 0x243   :  { %v949_v12 = vadd.f32 %v1736_v45, %v846_v11 }
 0x245   :  { %988 = vst.msk [vmem:[%s1943_s7 + $0x40] sm:$0xff] %vm979_vm4, %v949_v12 }
 0x246   :  { %v849_v13 = vpop.xlane.xlu1 %848 }
 0x247   :  { %v950_v14 = vadd.f32 %v1736_v45, %v849_v13 }
 0x249   :  { %989 = vst.msk [vmem:[%s1943_s7 + $0x48] sm:$0xff] %vm979_vm4, %v950_v14 }
 0x24a   :  { %v852_v16 = vpop.xlane.xlu0 %851 }
 0x24b   :  { %v951_v17 = vadd.f32 %v1736_v45, %v852_v16 }
 0x24d   :  { %990 = vst.msk [vmem:[%s1943_s7 + $0x50] sm:$0xff] %vm979_vm4, %v951_v17 }
 0x24e   :  { %v855_v18 = vpop.xlane.xlu1 %854 }
 0x24f   :  { %v952_v30 = vadd.f32 %v1736_v45, %v855_v18 }
 0x251   :  { %991 = vst.msk [vmem:[%s1943_s7 + $0x58] sm:$0xff] %vm979_vm4, %v952_v30 }
 0x252   :  { %v858_v19 = vpop.xlane.xlu0 %857 }
 0x253   :  { %v953_v20 = vadd.f32 %v1736_v45, %v858_v19 }
 0x255   :  { %992 = vst.msk [vmem:[%s1943_s7 + $0x60] sm:$0xff] %vm979_vm4, %v953_v20 }
 0x256   :  { %v861_v21 = vpop.xlane.xlu1 %860 }
 0x257   :  { %v954_v22 = vadd.f32 %v1736_v45, %v861_v21 }
 0x259   :  { %993 = vst.msk [vmem:[%s1943_s7 + $0x68] sm:$0xff] %vm979_vm4, %v954_v22 }
 0x25a   :  { %v864_v23 = vpop.xlane.xlu0 %863 }
 0x25b   :  { %v955_v24 = vadd.f32 %v1736_v45, %v864_v23 }
 0x25d   :  { %994 = vst.msk [vmem:[%s1943_s7 + $0x70] sm:$0xff] %vm979_vm4, %v955_v24 }
 0x25e   :  { %v867_v25 = vpop.xlane.xlu1 %866 }
 0x25f   :  { %v956_v26 = vadd.f32 %v1736_v45, %v867_v25 }
 0x261   :  { %995 = vst.msk [vmem:[%s1943_s7 + $0x78] sm:$0xff] %vm979_vm4, %v956_v26 }
 0x262   :  { %v870_v27 = vpop.xlane.xlu0 %869 }
 0x263   :  { %v957_v28 = vadd.f32 %v1736_v45, %v870_v27 }
 0x265   :  { %996 = vst.msk [vmem:[%s1943_s7 + $0x80] sm:$0xff] %vm979_vm4, %v957_v28 }
 0x266   :  { %v873_v29 = vpop.xlane.xlu1 %872 }
 0x267   :  { %v958_v31 = vadd.f32 %v1736_v45, %v873_v29 }
 0x269   :  { %997 = vst.msk [vmem:[%s1943_s7 + $0x88] sm:$0xff] %vm979_vm4, %v958_v31 }
 0x26a   :  { %v876_v32 = vpop.xlane.xlu0 %875 }
 0x26b   :  { %v959_v33 = vadd.f32 %v1736_v45, %v876_v32 }
 0x26d   :  { %998 = vst.msk [vmem:[%s1943_s7 + $0x90] sm:$0xff] %vm979_vm4, %v959_v33 }
 0x26e   :  { %v879_v34 = vpop.xlane.xlu1 %878 }
 0x26f   :  { %v960_v35 = vadd.f32 %v1736_v45, %v879_v34 }
 0x271   :  { %999 = vst.msk [vmem:[%s1943_s7 + $0x98] sm:$0xff] %vm979_vm4, %v960_v35 }
 0x272   :  { %v882_v36 = vpop.xlane.xlu0 %881 }
 0x273   :  { %v961_v37 = vadd.f32 %v1736_v45, %v882_v36 }
 0x275   :  { %1000 = vst.msk [vmem:[%s1943_s7 + $0xa0] sm:$0xff] %vm979_vm4, %v961_v37 }
 0x276   :  { %v885_v38 = vpop.xlane.xlu1 %884 }
 0x277   :  { %v962_v39 = vadd.f32 %v1736_v45, %v885_v38 }
 0x279   :  { %1001 = vst.msk [vmem:[%s1943_s7 + $0xa8] sm:$0xff] %vm979_vm4, %v962_v39 }
 0x27a   :  { %v888_v40 = vpop.xlane.xlu0 %887 }
 0x27b   :  { %v963_v41 = vadd.f32 %v1736_v45, %v888_v40 }
 0x27d   :  { %1002 = vst.msk [vmem:[%s1943_s7 + $0xb0] sm:$0xff] %vm979_vm4, %v963_v41 }
 0x27e   :  { %v891_v42 = vpop.xlane.xlu1 %890 }
 0x27f   :  { %v964_v43 = vadd.f32 %v1736_v45, %v891_v42 }
 0x281   :  { %1003 = vst.msk [vmem:[%s1943_s7 + $0xb8] sm:$0xff] %vm979_vm4, %v964_v43 }
 0x282   :  { %v894_v44 = vpop.xlane.xlu0 %893 }
 0x283   :  { %v965_v46 = vadd.f32 %v1736_v45, %v894_v44 }
 0x285   :  { %1004 = vst.msk [vmem:[%s1943_s7 + $0xc0] sm:$0xff] %vm979_vm4, %v965_v46 }
 0x286   :  { %v897_v47 = vpop.xlane.xlu1 %896 }
 0x287   :  { %v966_v48 = vadd.f32 %v1736_v45, %v897_v47 }
 0x289   :  { %1005 = vst.msk [vmem:[%s1943_s7 + $0xc8] sm:$0xff] %vm979_vm4, %v966_v48 }
 0x28a   :  { %v900_v49 = vpop.xlane.xlu0 %899 }
 0x28b   :  { %v967_v50 = vadd.f32 %v1736_v45, %v900_v49 }
 0x28d   :  { %1006 = vst.msk [vmem:[%s1943_s7 + $0xd0] sm:$0xff] %vm979_vm4, %v967_v50 }
 0x28e   :  { %v903_v51 = vpop.xlane.xlu1 %902 }
 0x28f   :  { %v968_v52 = vadd.f32 %v1736_v45, %v903_v51 }
 0x291   :  { %1007 = vst.msk [vmem:[%s1943_s7 + $0xd8] sm:$0xff] %vm979_vm4, %v968_v52 }
 0x292   :  { %v906_v53 = vpop.xlane.xlu0 %905 }
 0x293   :  { %v969_v54 = vadd.f32 %v1736_v45, %v906_v53 }
 0x295   :  { %1008 = vst.msk [vmem:[%s1943_s7 + $0xe0] sm:$0xff] %vm979_vm4, %v969_v54 }
 0x296   :  { %v909_v55 = vpop.xlane.xlu1 %908 }
 0x297   :  { %v970_v56 = vadd.f32 %v1736_v45, %v909_v55 }
 0x299   :  { %1009 = vst.msk [vmem:[%s1943_s7 + $0xe8] sm:$0xff] %vm979_vm4, %v970_v56 }
 0x29a   :  { %v912_v57 = vpop.xlane.xlu0 %911 }
 0x29b   :  { %v971_v58 = vadd.f32 %v1736_v45, %v912_v57 }
 0x29d   :  { %1010 = vst.msk [vmem:[%s1943_s7 + $0xf0] sm:$0xff] %vm979_vm4, %v971_v58 }
 0x29e   :  { %v915_v59 = vpop.xlane.xlu1 %914 }
 0x29f   :  { %v972_v60 = vadd.f32 %v1736_v45, %v915_v59 }
 0x2a1   :  { %1011 = vst.msk [vmem:[%s1943_s7 + $0xf8] sm:$0xff] %vm979_vm4, %v972_v60 }
 0x2a2   :  { %v918_v61 = vpop.xlane.xlu0 %917 }
 0x2a3   :  { %v973_v62 = vadd.f32 %v1736_v45, %v918_v61 }
 0x2a5   :  { %1012 = vst.msk [vmem:[%s1943_s7 + $0x100] sm:$0xff] %vm979_vm4, %v973_v62 }
 0x2a6   :  { %v921_v63 = vpop.xlane.xlu1 %920 }
 0x2a7   :  { %v974_v15 = vadd.f32 %v1736_v45, %v921_v63 }
 0x2a9   :  { %1013 = vst.msk [vmem:[%s1943_s7 + $0x108] sm:$0xff] %vm979_vm4, %v974_v15 }
 0x2aa   :  { %v924_v1 = vpop.xlane.xlu0 %923 }
 0x2ab   :  { %v975_v2 = vadd.f32 %v1736_v45, %v924_v1 }
 0x2ad   :  { %1014 = vst.msk [vmem:[%s1943_s7 + $0x110] sm:$0xff] %vm979_vm4, %v975_v2 }
 0x2ae   :  { %v927_v3 = vpop.xlane.xlu1 %926 }
 0x2af   :  { %v976_v4 = vadd.f32 %v1736_v45, %v927_v3 }
 0x2b1   :  { %1015 = vst.msk [vmem:[%s1943_s7 + $0x118] sm:$0xff] %vm979_vm4, %v976_v4 }
 0x2b2   :  { %v930_v0 = vpop.xlane.xlu0 %929 }
 0x2b3   :  { %v977_v5 = vadd.f32 %v1736_v45, %v930_v0 }
 0x2b5   :  { %1016 = vst.msk [vmem:[%s1943_s7 + $0x120] sm:$0xff] %vm979_vm4, %v977_v5 }
 0x2b6   :  { %v933_v6 = vpop.xlane.xlu1 %932 }
 0x2b7   :  { %v978_v7 = vadd.f32 %v1736_v45, %v933_v6 }
 0x2b9   :  { %1017 = vst.msk [vmem:[%s1943_s7 + $0x128] sm:$0xff] %vm979_vm4, %v978_v7 }

</bundles_post_ra>
